<compile_context>
chip_gen: v6e
topology: v6e:2x2x1
jax: 0.10.0
libtpu: 0.0.40
codegen_flags: <defaults>
</compile_context>

<pallas_src>
import functools
import math

import jax
import jax.numpy as jnp
from jax.experimental import pallas as pl
from jax.experimental.pallas import tpu as pltpu


def _round_up(x, m):
    return ((x + m - 1) // m) * m


def _vmem_limit_bytes():
    # 64 MiB is a safe raise over the scoped default on v5e/v6e (128 MiB physical),
    # but equals v7x's entire per-TensorCore VMEM -> leave 25% headroom there.
    try:
        cap = pltpu.get_tpu_info().vmem_capacity_bytes
        return min(64 * 1024 * 1024, int(0.75 * cap))
    except Exception:
        return 64 * 1024 * 1024


_VMEM_LIMIT = _vmem_limit_bytes()


def _use_bf16_exp():
    # bf16 exponentials roughly double EUP throughput on v6e/v7x; v5e (and older)
    # EUP has no bf16 path, keep f32 there.
    try:
        kind = jax.devices()[0].device_kind.lower()
    except Exception:
        return False
    return not any(v in kind for v in ("v2", "v3", "v4", "v5"))


# ---------------------------------------------------------------------------
# One-time weight preprocessing (hoisted out of the forward path).
# PyTorch layout in:  wqkv (C, 3C), bqkv (1, 3C), wproj (C, C), bproj (1, C).
# ---------------------------------------------------------------------------
def prepare_weights(wqkv, bqkv, wproj, bproj, n_head):
    C = wqkv.shape[0]
    assert C % n_head == 0
    D = C // n_head
    scale = 1.0 / math.sqrt(D)
    # Fold 1/sqrt(D) into the q columns of the QKV projection (zero runtime cost).
    wqkv_s = wqkv.at[:, :C].multiply(scale).astype(jnp.bfloat16)
    bqkv_s = bqkv.at[:, :C].multiply(scale).astype(jnp.float32)
    # Output projection stored head-major: row c = (h, d)  ->  (H, D, C).
    wproj_hdc = wproj.reshape(n_head, D, C).astype(jnp.bfloat16)
    bproj_f = bproj.astype(jnp.float32)
    return dict(wqkv=wqkv_s, bqkv=bqkv_s, wproj=wproj_hdc, bproj=bproj_f,
                n_head=n_head)


# ---------------------------------------------------------------------------
# Fused QKV projection + head-major scatter.
#   x (B, T, C) f32  ->  qkv_heads (3H, B, T, D) bf16
# Weight (C, 3C) and bias (1, 3C) are fully VMEM-resident (constant index_map).
# ---------------------------------------------------------------------------
def _qkv_project_kernel(x_ref, w_ref, b_ref, o_ref, *, n_head, head_dim):
    # x: (1, tq, C) f32 | w: (C, 3C) bf16 (q cols pre-scaled) | b: (1, 3C) f32
    # o: (3H, 1, tq, D) bf16
    x = x_ref[0].astype(w_ref.dtype)                 # f32->bf16 on the fly (VPU)
    acc = jnp.dot(x, w_ref[...], preferred_element_type=jnp.float32)
    acc = (acc + b_ref[...]).astype(o_ref.dtype)     # (tq, 3C) bf16
    # In-kernel head scatter: avoids the 3 wrapper-side XLA transposes entirely.
    for g in range(3 * n_head):
        col = g * head_dim
        o_ref[g, 0] = acc[:, col:col + head_dim]


def _qkv_project(x, wqkv, bqkv, n_head, *, tq):
    B, T, C = x.shape
    D = C // n_head
    flops = 2 * B * T * C * 3 * C
    bytes_accessed = (B * T * C * x.dtype.itemsize
                      + 3 * C * C * wqkv.dtype.itemsize
                      + 3 * C * bqkv.dtype.itemsize
                      + 3 * B * T * C * 2)
    # TODO(synk): for very large n_embd the resident (C,3C) bf16 weight (x2 buffers)
    # can exceed the v7x VMEM budget; fall back to streamed N-tiles with large tm then.
    return pl.pallas_call(
        functools.partial(_qkv_project_kernel, n_head=n_head, head_dim=D),
        out_shape=jax.ShapeDtypeStruct((3 * n_head, B, T, D), jnp.bfloat16),
        grid_spec=pltpu.PrefetchScalarGridSpec(
            num_scalar_prefetch=0,
            grid=(B, T // tq),
            in_specs=[
                pl.BlockSpec((1, tq, C), lambda b, i: (b, i, 0)),     # activations
                pl.BlockSpec((C, 3 * C), lambda b, i: (0, 0)),        # weight, resident
                pl.BlockSpec((1, 3 * C), lambda b, i: (0, 0)),        # bias, resident
            ],
            out_specs=pl.BlockSpec((3 * n_head, 1, tq, D),
                                   lambda b, i: (0, b, i, 0)),
        ),
        compiler_params=pltpu.CompilerParams(
            dimension_semantics=("parallel", "parallel"),
            vmem_limit_bytes=_VMEM_LIMIT,
        ),
        cost_estimate=pl.CostEstimate(flops=flops, transcendentals=0,
                                      bytes_accessed=bytes_accessed),
    )(x, wqkv, bqkv)


# ---------------------------------------------------------------------------
# Flash attention with online softmax, causal block skipping, and clamped K/V
# DMA (future tiles are never fetched).  qkv_heads: (3H, B, T, D) bf16, where
# rows [0,H) are q heads, [H,2H) k heads, [2H,3H) v heads.
# ---------------------------------------------------------------------------
def _flash_attn_kernel(q_ref, k_ref, v_ref, o_ref, m_ref, l_ref, acc_ref,
                       *, block_q, block_k, exp_bf16):
    qi = pl.program_id(2)
    ki = pl.program_id(3)
    nk = pl.num_programs(3)

    q_start = qi * block_q
    kv_start = ki * block_k

    needed = kv_start <= q_start + (block_q - 1)          # tile has >=1 causal entry
    full = kv_start + (block_k - 1) <= q_start            # tile entirely below diagonal

    @pl.when(ki == 0)
    def _init():
        m_ref[...] = jnp.full(m_ref.shape, -1e30, dtype=jnp.float32)
        l_ref[...] = jnp.zeros(l_ref.shape, dtype=jnp.float32)
        acc_ref[...] = jnp.zeros(acc_ref.shape, dtype=jnp.float32)

    def _compute(apply_mask):
        q = q_ref[0, 0]                                    # (block_q, D) bf16 (pre-scaled)
        k = k_ref[0, 0]                                    # (block_k, D) bf16
        v = v_ref[0, 0]                                    # (block_k, D) bf16
        s = jax.lax.dot_general(q, k, (((1,), (1,)), ((), ())),
                                preferred_element_type=jnp.float32)
        if apply_mask:   # only diagonal tiles build the iota mask
            row = q_start + jax.lax.broadcasted_iota(jnp.int32, s.shape, 0)
            col = kv_start + jax.lax.broadcasted_iota(jnp.int32, s.shape, 1)
            # Large-negative finite instead of -inf: exp underflows to 0 and the
            # causal diagonal guarantees >=1 unmasked entry per (valid) row.
            s = jnp.where(col <= row, s, jnp.float32(-1e30))

        m_prev = m_ref[...]
        m_new = jnp.maximum(m_prev, jnp.max(s, axis=-1, keepdims=True))
        alpha = jnp.exp(m_prev - m_new)
        if exp_bf16:     # EUP bf16 path (v6e/v7x); stats/accumulator stay f32
            p = jnp.exp((s - m_new).astype(jnp.bfloat16))
        else:
            p = jnp.exp(s - m_new)
        l_ref[...] = alpha * l_ref[...] + jnp.sum(
            p.astype(jnp.float32), axis=-1, keepdims=True)
        acc_ref[...] = alpha * acc_ref[...] + jnp.dot(
            p.astype(v.dtype), v, preferred_element_type=jnp.float32)
        m_ref[...] = m_new

    @pl.when(jnp.logical_and(needed, full))
    def _full_tile():
        _compute(apply_mask=False)

    @pl.when(jnp.logical_and(needed, jnp.logical_not(full)))
    def _diag_tile():
        _compute(apply_mask=True)

    # TODO(synk): a scalar-prefetch-compacted kv schedule could also remove the
    # skipped grid steps (~0.35us each); currently they only cost the step overhead.

    @pl.when(ki == nk - 1)
    def _finalize():
        inv_l = pl.reciprocal(l_ref[...], approx=True)     # EUP, effectively free
        o_ref[0, 0] = (acc_ref[...] * inv_l).astype(o_ref.dtype)


def _flash_attention(qkv_heads, *, block_q, block_k, exp_bf16):
    GH, B, T, D = qkv_heads.shape
    H = GH // 3
    nq = T // block_q
    nk = T // block_k

    def q_map(b, h, qi, ki):
        return (h, b, qi, 0)

    def make_kv_map(group):
        def _map(b, h, qi, ki):
            # Clamp future kv tiles to the last needed block so their DMA is never
            # issued (pl.when inside the kernel skips the compute for them).
            last = ((qi + 1) * block_q - 1) // block_k
            return (group * H + h, b, jnp.minimum(ki, last), 0)
        return _map

    kernel = functools.partial(_flash_attn_kernel, block_q=block_q,
                               block_k=block_k, exp_bf16=exp_bf16)
    flops = 2 * B * H * T * T * D            # causal: ~half the tiles contribute
    bytes_accessed = 4 * B * H * T * D * qkv_heads.dtype.itemsize

    # TODO(synk): on v5e, if K/V DMA is exposed, add pipeline_mode=pl.Buffered(3)
    # to the k/v specs; VMEM cost per extra buffer is only block_k*D bf16.
    return pl.pallas_call(
        kernel,
        out_shape=jax.ShapeDtypeStruct((B, H, T, D), jnp.bfloat16),
        grid_spec=pltpu.PrefetchScalarGridSpec(
            num_scalar_prefetch=0,
            grid=(B, H, nq, nk),             # kv (reduction) axis last
            in_specs=[
                pl.BlockSpec((1, 1, block_q, D), q_map),
                pl.BlockSpec((1, 1, block_k, D), make_kv_map(1)),
                pl.BlockSpec((1, 1, block_k, D), make_kv_map(2)),
            ],
            out_specs=pl.BlockSpec((1, 1, block_q, D),
                                   lambda b, h, qi, ki: (b, h, qi, 0)),
            scratch_shapes=[
                pltpu.VMEM((block_q, 1), jnp.float32),   # running max m
                pltpu.VMEM((block_q, 1), jnp.float32),   # running sum l
                pltpu.VMEM((block_q, D), jnp.float32),   # accumulator
            ],
        ),
        compiler_params=pltpu.CompilerParams(
            dimension_semantics=("parallel", "parallel", "parallel", "arbitrary"),
            vmem_limit_bytes=_VMEM_LIMIT,
        ),
        cost_estimate=pl.CostEstimate(flops=flops,
                                      transcendentals=B * H * T * T // 2,
                                      bytes_accessed=bytes_accessed),
    )(qkv_heads, qkv_heads, qkv_heads)


# ---------------------------------------------------------------------------
# Fused head-merge + output projection:
#   y (B, H, T, D) bf16, wproj (H, D, C) bf16, bias (1, C) f32 -> (B, T, C)
# No wrapper transpose: the head reduction happens in-kernel, weight is resident.
# ---------------------------------------------------------------------------
def _merge_proj_kernel(y_ref, w_ref, b_ref, o_ref, *, n_head):
    acc = jnp.dot(y_ref[0, 0], w_ref[0], preferred_element_type=jnp.float32)
    for h in range(1, n_head):
        acc = acc + jnp.dot(y_ref[0, h], w_ref[h],
                            preferred_element_type=jnp.float32)
    o_ref[0] = (acc + b_ref[...]).astype(o_ref.dtype)


def _merge_proj(y, wproj_hdc, bproj, out_dtype, *, tq):
    B, H, T, D = y.shape
    N = wproj_hdc.shape[-1]
    flops = 2 * B * T * H * D * N
    bytes_accessed = (B * H * T * D * y.dtype.itemsize
                      + H * D * N * wproj_hdc.dtype.itemsize
                      + N * bproj.dtype.itemsize
                      + B * T * N * jnp.dtype(out_dtype).itemsize)
    return pl.pallas_call(
        functools.partial(_merge_proj_kernel, n_head=H),
        out_shape=jax.ShapeDtypeStruct((B, T, N), out_dtype),
        grid_spec=pltpu.PrefetchScalarGridSpec(
            num_scalar_prefetch=0,
            grid=(B, T // tq),
            in_specs=[
                pl.BlockSpec((1, H, tq, D), lambda b, i: (b, 0, i, 0)),  # y, in place
                pl.BlockSpec((H, D, N), lambda b, i: (0, 0, 0)),         # weight, resident
                pl.BlockSpec((1, N), lambda b, i: (0, 0)),               # bias, resident
            ],
            out_specs=pl.BlockSpec((1, tq, N), lambda b, i: (b, i, 0)),
        ),
        compiler_params=pltpu.CompilerParams(
            dimension_semantics=("parallel", "parallel"),
            vmem_limit_bytes=_VMEM_LIMIT,
        ),
        cost_estimate=pl.CostEstimate(flops=flops, transcendentals=0,
                                      bytes_accessed=bytes_accessed),
    )(y, wproj_hdc, bproj)


# ---------------------------------------------------------------------------
# Full CausalSelfAttention forward.  params comes from prepare_weights().
# ---------------------------------------------------------------------------
def causal_self_attention(x, params, *, block_q=256, block_k=128):
    B, T, C = x.shape
    H = params["n_head"]
    assert C % H == 0

    # Pad T to a tile multiple (robustness; no silent fallback to full-T blocks).
    # Padded key positions (index >= T) can never be attended by valid queries due
    # to the causal mask, and padded query rows are sliced off below.
    block_q = min(block_q, _round_up(T, 8))
    block_k = min(block_k, _round_up(T, 8))
    T_pad = _round_up(T, math.lcm(block_q, block_k))
    if T_pad != T:
        x = jnp.pad(x, ((0, 0), (0, T_pad - T), (0, 0)))

    # 1) fused QKV projection -> head-major (3H, B, T_pad, D), no XLA transposes
    qkv_heads = _qkv_project(x, params["wqkv"], params["bqkv"], H, tq=block_q)

    # 2) flash attention with causal masking, block skipping, clamped K/V DMA
    y = _flash_attention(qkv_heads, block_q=block_q, block_k=block_k,
                         exp_bf16=_use_bf16_exp())          # (B, H, T_pad, D)

    # 3) fused head-merge + output projection -> (B, T_pad, C)
    out = _merge_proj(y, params["wproj"], params["bproj"],
                      out_dtype=x.dtype, tq=block_q)

    if T_pad != T:
        out = out[:, :T, :]
    # TODO(synk): attn_dropout / resid_dropout are identity (p=0 / eval mode).
    return out


# ---------------------------------------------------------------------------
# Pure-JAX reference matching the PyTorch forward (mirroring the bf16 matmul
# operand casts so the comparison is apples-to-apples).
# ---------------------------------------------------------------------------
def reference_attention(x, wqkv, bqkv, wproj, bproj, n_head, mirror_bf16=True):
    cast = (lambda a: a.astype(jnp.bfloat16)) if mirror_bf16 else (lambda a: a)
    B, T, C = x.shape
    H, D = n_head, C // n_head

    qkv = jnp.dot(cast(x.reshape(B * T, C)), cast(wqkv),
                  preferred_element_type=jnp.float32) + bqkv
    qkv = cast(qkv).astype(jnp.float32).reshape(B, T, 3, H, D)
    q, k, v = qkv[:, :, 0], qkv[:, :, 1], qkv[:, :, 2]           # (B, T, H, D)

    s = jnp.einsum('bthd,bshd->bhts', q, k) / math.sqrt(D)
    mask = jnp.tril(jnp.ones((T, T), dtype=bool))
    s = jnp.where(mask[None, None], s, -jnp.inf)
    p = jax.nn.softmax(s, axis=-1)
    y = jnp.einsum('bhts,bshd->bthd', p, v).reshape(B * T, C)

    out = jnp.dot(cast(y), cast(wproj),
                  preferred_element_type=jnp.float32) + bproj
    return out.reshape(B, T, C).astype(x.dtype)


if __name__ == "__main__":
    # Small config consistent with the module: n_embd=32, n_head=4, seq=8, batch=2.
    B, T, C, H = 2, 8, 32, 4

    key = jax.random.PRNGKey(0)
    kx, k1, k2, k3, k4 = jax.random.split(key, 5)

    x = jax.random.normal(kx, (B, T, C), dtype=jnp.float32)
    # Linear weights stored transposed (in_features, out_features), PyTorch-equivalent.
    wqkv = jax.random.normal(k1, (C, 3 * C), dtype=jnp.float32) * 0.02
    bqkv = jax.random.normal(k2, (1, 3 * C), dtype=jnp.float32) * 0.02
    wproj = jax.random.normal(k3, (C, C), dtype=jnp.float32) * 0.02
    bproj = jax.random.normal(k4, (1, C), dtype=jnp.float32) * 0.02

    params = prepare_weights(wqkv, bqkv, wproj, bproj, H)   # one-time, hoisted
    out = causal_self_attention(x, params)
    out = jax.block_until_ready(out)

    ref = reference_attention(x, wqkv, bqkv, wproj, bproj, H, mirror_bf16=True)
    assert out.shape == (B, T, C)
    err = jnp.max(jnp.abs(out - ref))
    assert jnp.allclose(out, ref, atol=5e-3, rtol=2e-2), f"max abs err = {err}"

    print("KERNEL_OK")
</pallas_src>

<mosaic_0001>
module attributes {stable_mosaic.version = 11 : i64} {
  func.func @_qkv_project_kernel(%arg0: i32, %arg1: i32, %arg2: memref<1x8x32xf32, #tpu.memory_space<vmem>>, %arg3: memref<32x96xbf16, #tpu.memory_space<vmem>>, %arg4: memref<1x96xf32, #tpu.memory_space<vmem>>, %arg5: memref<12x1x8x8xbf16, #tpu.memory_space<vmem>>) attributes {dimension_semantics = [#tpu.dimension_semantics<parallel>, #tpu.dimension_semantics<parallel>], iteration_bounds = array<i64: 2, 1>, scalar_prefetch = 0 : i64, scratch_operands = 0 : i64, tpu.core_type = #tpu.core_type<tc>, window_params = [{transform_indices = @transform_0, window_bounds = array<i64: 1, 8, 32>}, {pipeline_mode = #tpu.pipeline_mode<synchronous>, transform_indices = @transform_1, window_bounds = array<i64: 32, 96>}, {pipeline_mode = #tpu.pipeline_mode<synchronous>, transform_indices = @transform_2, window_bounds = array<i64: 1, 96>}, {transform_indices = @transform_3, window_bounds = array<i64: 12, 1, 8, 8>}]} {
    %c0 = arith.constant 0 : index
    %c0_0 = arith.constant 0 : index
    %c0_1 = arith.constant 0 : index
    %0 = vector.load %arg2[%c0, %c0_0, %c0_1] : memref<1x8x32xf32, #tpu.memory_space<vmem>>, vector<1x8x32xf32>
    %1 = vector.shape_cast %0 : vector<1x8x32xf32> to vector<8x32xf32>
    %2 = arith.truncf %1 : vector<8x32xf32> to vector<8x32xbf16>
    %c0_2 = arith.constant 0 : index
    %c0_3 = arith.constant 0 : index
    %3 = vector.load %arg3[%c0_2, %c0_3] : memref<32x96xbf16, #tpu.memory_space<vmem>>, vector<32x96xbf16>
    %cst = arith.constant dense<0.000000e+00> : vector<8x96xf32>
    %4 = tpu.matmul %2, %3, %cst {dimension_numbers = #tpu.dot_dimension_numbers<[1], [0], [0], [1], [0, 0, 1, 1], [], []>} : vector<8x32xbf16>, vector<32x96xbf16>, vector<8x96xf32> -> vector<8x96xf32>
    %c0_4 = arith.constant 0 : index
    %c0_5 = arith.constant 0 : index
    %5 = vector.load %arg4[%c0_4, %c0_5] : memref<1x96xf32, #tpu.memory_space<vmem>>, vector<1x96xf32>
    %6 = vector.broadcast %5 : vector<1x96xf32> to vector<8x96xf32>
    %7 = arith.addf %4, %6 : vector<8x96xf32>
    %8 = arith.truncf %7 : vector<8x96xf32> to vector<8x96xbf16>
    %9 = vector.extract_strided_slice %8 {offsets = [0, 0], sizes = [8, 8], strides = [1, 1]} : vector<8x96xbf16> to vector<8x8xbf16>
    %c0_6 = arith.constant 0 : index
    %c0_7 = arith.constant 0 : index
    %c0_8 = arith.constant 0 : index
    %c0_9 = arith.constant 0 : index
    %10 = vector.load %arg5[%c0_6, %c0_7, %c0_8, %c0_9] : memref<12x1x8x8xbf16, #tpu.memory_space<vmem>>, vector<1x1x8x8xbf16>
    %11 = vector.shape_cast %10 : vector<1x1x8x8xbf16> to vector<8x8xbf16>
    %12 = vector.shape_cast %9 : vector<8x8xbf16> to vector<1x1x8x8xbf16>
    tpu.vector_store %arg5[%c0_6, %c0_7, %c0_8, %c0_9], %12 {strides = array<i32>} : memref<12x1x8x8xbf16, #tpu.memory_space<vmem>>, vector<1x1x8x8xbf16>,
    %13 = vector.extract_strided_slice %8 {offsets = [0, 8], sizes = [8, 8], strides = [1, 1]} : vector<8x96xbf16> to vector<8x8xbf16>
    %c1 = arith.constant 1 : index
    %c0_10 = arith.constant 0 : index
    %c0_11 = arith.constant 0 : index
    %c0_12 = arith.constant 0 : index
    %14 = vector.load %arg5[%c1, %c0_10, %c0_11, %c0_12] : memref<12x1x8x8xbf16, #tpu.memory_space<vmem>>, vector<1x1x8x8xbf16>
    %15 = vector.shape_cast %14 : vector<1x1x8x8xbf16> to vector<8x8xbf16>
    %16 = vector.shape_cast %13 : vector<8x8xbf16> to vector<1x1x8x8xbf16>
    tpu.vector_store %arg5[%c1, %c0_10, %c0_11, %c0_12], %16 {strides = array<i32>} : memref<12x1x8x8xbf16, #tpu.memory_space<vmem>>, vector<1x1x8x8xbf16>,
    %17 = vector.extract_strided_slice %8 {offsets = [0, 16], sizes = [8, 8], strides = [1, 1]} : vector<8x96xbf16> to vector<8x8xbf16>
    %c2 = arith.constant 2 : index
    %c0_13 = arith.constant 0 : index
    %c0_14 = arith.constant 0 : index
    %c0_15 = arith.constant 0 : index
    %18 = vector.load %arg5[%c2, %c0_13, %c0_14, %c0_15] : memref<12x1x8x8xbf16, #tpu.memory_space<vmem>>, vector<1x1x8x8xbf16>
    %19 = vector.shape_cast %18 : vector<1x1x8x8xbf16> to vector<8x8xbf16>
    %20 = vector.shape_cast %17 : vector<8x8xbf16> to vector<1x1x8x8xbf16>
    tpu.vector_store %arg5[%c2, %c0_13, %c0_14, %c0_15], %20 {strides = array<i32>} : memref<12x1x8x8xbf16, #tpu.memory_space<vmem>>, vector<1x1x8x8xbf16>,
    %21 = vector.extract_strided_slice %8 {offsets = [0, 24], sizes = [8, 8], strides = [1, 1]} : vector<8x96xbf16> to vector<8x8xbf16>
    %c3 = arith.constant 3 : index
    %c0_16 = arith.constant 0 : index
    %c0_17 = arith.constant 0 : index
    %c0_18 = arith.constant 0 : index
    %22 = vector.load %arg5[%c3, %c0_16, %c0_17, %c0_18] : memref<12x1x8x8xbf16, #tpu.memory_space<vmem>>, vector<1x1x8x8xbf16>
    %23 = vector.shape_cast %22 : vector<1x1x8x8xbf16> to vector<8x8xbf16>
    %24 = vector.shape_cast %21 : vector<8x8xbf16> to vector<1x1x8x8xbf16>
    tpu.vector_store %arg5[%c3, %c0_16, %c0_17, %c0_18], %24 {strides = array<i32>} : memref<12x1x8x8xbf16, #tpu.memory_space<vmem>>, vector<1x1x8x8xbf16>,
    %25 = vector.extract_strided_slice %8 {offsets = [0, 32], sizes = [8, 8], strides = [1, 1]} : vector<8x96xbf16> to vector<8x8xbf16>
    %c4 = arith.constant 4 : index
    %c0_19 = arith.constant 0 : index
    %c0_20 = arith.constant 0 : index
    %c0_21 = arith.constant 0 : index
    %26 = vector.load %arg5[%c4, %c0_19, %c0_20, %c0_21] : memref<12x1x8x8xbf16, #tpu.memory_space<vmem>>, vector<1x1x8x8xbf16>
    %27 = vector.shape_cast %26 : vector<1x1x8x8xbf16> to vector<8x8xbf16>
    %28 = vector.shape_cast %25 : vector<8x8xbf16> to vector<1x1x8x8xbf16>
    tpu.vector_store %arg5[%c4, %c0_19, %c0_20, %c0_21], %28 {strides = array<i32>} : memref<12x1x8x8xbf16, #tpu.memory_space<vmem>>, vector<1x1x8x8xbf16>,
    %29 = vector.extract_strided_slice %8 {offsets = [0, 40], sizes = [8, 8], strides = [1, 1]} : vector<8x96xbf16> to vector<8x8xbf16>
    %c5 = arith.constant 5 : index
    %c0_22 = arith.constant 0 : index
    %c0_23 = arith.constant 0 : index
    %c0_24 = arith.constant 0 : index
    %30 = vector.load %arg5[%c5, %c0_22, %c0_23, %c0_24] : memref<12x1x8x8xbf16, #tpu.memory_space<vmem>>, vector<1x1x8x8xbf16>
    %31 = vector.shape_cast %30 : vector<1x1x8x8xbf16> to vector<8x8xbf16>
    %32 = vector.shape_cast %29 : vector<8x8xbf16> to vector<1x1x8x8xbf16>
    tpu.vector_store %arg5[%c5, %c0_22, %c0_23, %c0_24], %32 {strides = array<i32>} : memref<12x1x8x8xbf16, #tpu.memory_space<vmem>>, vector<1x1x8x8xbf16>,
    %33 = vector.extract_strided_slice %8 {offsets = [0, 48], sizes = [8, 8], strides = [1, 1]} : vector<8x96xbf16> to vector<8x8xbf16>
    %c6 = arith.constant 6 : index
    %c0_25 = arith.constant 0 : index
    %c0_26 = arith.constant 0 : index
    %c0_27 = arith.constant 0 : index
    %34 = vector.load %arg5[%c6, %c0_25, %c0_26, %c0_27] : memref<12x1x8x8xbf16, #tpu.memory_space<vmem>>, vector<1x1x8x8xbf16>
    %35 = vector.shape_cast %34 : vector<1x1x8x8xbf16> to vector<8x8xbf16>
    %36 = vector.shape_cast %33 : vector<8x8xbf16> to vector<1x1x8x8xbf16>
    tpu.vector_store %arg5[%c6, %c0_25, %c0_26, %c0_27], %36 {strides = array<i32>} : memref<12x1x8x8xbf16, #tpu.memory_space<vmem>>, vector<1x1x8x8xbf16>,
    %37 = vector.extract_strided_slice %8 {offsets = [0, 56], sizes = [8, 8], strides = [1, 1]} : vector<8x96xbf16> to vector<8x8xbf16>
    %c7 = arith.constant 7 : index
    %c0_28 = arith.constant 0 : index
    %c0_29 = arith.constant 0 : index
    %c0_30 = arith.constant 0 : index
    %38 = vector.load %arg5[%c7, %c0_28, %c0_29, %c0_30] : memref<12x1x8x8xbf16, #tpu.memory_space<vmem>>, vector<1x1x8x8xbf16>
    %39 = vector.shape_cast %38 : vector<1x1x8x8xbf16> to vector<8x8xbf16>
    %40 = vector.shape_cast %37 : vector<8x8xbf16> to vector<1x1x8x8xbf16>
    tpu.vector_store %arg5[%c7, %c0_28, %c0_29, %c0_30], %40 {strides = array<i32>} : memref<12x1x8x8xbf16, #tpu.memory_space<vmem>>, vector<1x1x8x8xbf16>,
    %41 = vector.extract_strided_slice %8 {offsets = [0, 64], sizes = [8, 8], strides = [1, 1]} : vector<8x96xbf16> to vector<8x8xbf16>
    %c8 = arith.constant 8 : index
    %c0_31 = arith.constant 0 : index
    %c0_32 = arith.constant 0 : index
    %c0_33 = arith.constant 0 : index
    %42 = vector.load %arg5[%c8, %c0_31, %c0_32, %c0_33] : memref<12x1x8x8xbf16, #tpu.memory_space<vmem>>, vector<1x1x8x8xbf16>
    %43 = vector.shape_cast %42 : vector<1x1x8x8xbf16> to vector<8x8xbf16>
    %44 = vector.shape_cast %41 : vector<8x8xbf16> to vector<1x1x8x8xbf16>
    tpu.vector_store %arg5[%c8, %c0_31, %c0_32, %c0_33], %44 {strides = array<i32>} : memref<12x1x8x8xbf16, #tpu.memory_space<vmem>>, vector<1x1x8x8xbf16>,
    %45 = vector.extract_strided_slice %8 {offsets = [0, 72], sizes = [8, 8], strides = [1, 1]} : vector<8x96xbf16> to vector<8x8xbf16>
    %c9 = arith.constant 9 : index
    %c0_34 = arith.constant 0 : index
    %c0_35 = arith.constant 0 : index
    %c0_36 = arith.constant 0 : index
    %46 = vector.load %arg5[%c9, %c0_34, %c0_35, %c0_36] : memref<12x1x8x8xbf16, #tpu.memory_space<vmem>>, vector<1x1x8x8xbf16>
    %47 = vector.shape_cast %46 : vector<1x1x8x8xbf16> to vector<8x8xbf16>
    %48 = vector.shape_cast %45 : vector<8x8xbf16> to vector<1x1x8x8xbf16>
    tpu.vector_store %arg5[%c9, %c0_34, %c0_35, %c0_36], %48 {strides = array<i32>} : memref<12x1x8x8xbf16, #tpu.memory_space<vmem>>, vector<1x1x8x8xbf16>,
    %49 = vector.extract_strided_slice %8 {offsets = [0, 80], sizes = [8, 8], strides = [1, 1]} : vector<8x96xbf16> to vector<8x8xbf16>
    %c10 = arith.constant 10 : index
    %c0_37 = arith.constant 0 : index
    %c0_38 = arith.constant 0 : index
    %c0_39 = arith.constant 0 : index
    %50 = vector.load %arg5[%c10, %c0_37, %c0_38, %c0_39] : memref<12x1x8x8xbf16, #tpu.memory_space<vmem>>, vector<1x1x8x8xbf16>
    %51 = vector.shape_cast %50 : vector<1x1x8x8xbf16> to vector<8x8xbf16>
    %52 = vector.shape_cast %49 : vector<8x8xbf16> to vector<1x1x8x8xbf16>
    tpu.vector_store %arg5[%c10, %c0_37, %c0_38, %c0_39], %52 {strides = array<i32>} : memref<12x1x8x8xbf16, #tpu.memory_space<vmem>>, vector<1x1x8x8xbf16>,
    %53 = vector.extract_strided_slice %8 {offsets = [0, 88], sizes = [8, 8], strides = [1, 1]} : vector<8x96xbf16> to vector<8x8xbf16>
    %c11 = arith.constant 11 : index
    %c0_40 = arith.constant 0 : index
    %c0_41 = arith.constant 0 : index
    %c0_42 = arith.constant 0 : index
    %54 = vector.load %arg5[%c11, %c0_40, %c0_41, %c0_42] : memref<12x1x8x8xbf16, #tpu.memory_space<vmem>>, vector<1x1x8x8xbf16>
    %55 = vector.shape_cast %54 : vector<1x1x8x8xbf16> to vector<8x8xbf16>
    %56 = vector.shape_cast %53 : vector<8x8xbf16> to vector<1x1x8x8xbf16>
    tpu.vector_store %arg5[%c11, %c0_40, %c0_41, %c0_42], %56 {strides = array<i32>} : memref<12x1x8x8xbf16, #tpu.memory_space<vmem>>, vector<1x1x8x8xbf16>,
    return
  }
  func.func @transform_0(%arg0: i32, %arg1: i32) -> (i32, i32, i32) {
    %c0_i32 = arith.constant 0 : i32
    %c0_i32_0 = arith.constant 0 : i32
    return %arg0, %arg1, %c0_i32 : i32, i32, i32
  }
  func.func @transform_1(%arg0: i32, %arg1: i32) -> (i32, i32) {
    %c0_i32 = arith.constant 0 : i32
    %c0_i32_0 = arith.constant 0 : i32
    %c0_i32_1 = arith.constant 0 : i32
    return %c0_i32, %c0_i32_0 : i32, i32
  }
  func.func @transform_2(%arg0: i32, %arg1: i32) -> (i32, i32) {
    %c0_i32 = arith.constant 0 : i32
    %c0_i32_0 = arith.constant 0 : i32
    %c0_i32_1 = arith.constant 0 : i32
    return %c0_i32, %c0_i32_0 : i32, i32
  }
  func.func @transform_3(%arg0: i32, %arg1: i32) -> (i32, i32, i32, i32) {
    %c0_i32 = arith.constant 0 : i32
    %c0_i32_0 = arith.constant 0 : i32
    %c0_i32_1 = arith.constant 0 : i32
    return %c0_i32, %arg0, %arg1, %c0_i32_0 : i32, i32, i32, i32
  }
}

</mosaic_0001>

<bundles_post_ra>
// kernel: tpu_custom_call.1
= control target key start
LH: loop header
LB: loop body
LE: loop exit
PB: predicated region body
PF: predicated region fallthrough
CT: control target
= control target key end

     0   :  { %8 = vsyncpa [#allocation3], 0  ;;  %s966_s0 = inlined_call_operand.hbm [shape: f32[2,8,32], index: 0, kind: input, shape index: {}]   ;;  %s967_s1 = inlined_call_operand.hbm [shape: bf16[32,96], index: 1, kind: input, shape index: {}]   ;;  %s968_s2 = inlined_call_operand.vmem [shape: f32[1,96], index: 2, kind: input, shape index: {}]   ;;  %s969_s3 = inlined_call_operand.vmem [shape: bf16[12,2,8,8], index: 3, kind: output, shape index: {}]  }
   0x1   :  { %10 = vsyncpa [#allocation3 + $0x1], 0 }
   0x2   :  { %11 = vsyncpa [#allocation5], 0  ;;  %s794_s12 = smov 0   ;;  %s796_s13 = smov 0  }
   0x3   :  { %s798_s14 = smov 0   ;;  %s800_s15 = smov 0  }
   0x4   :  { %s802_s16 = smov 0   ;;  %s804_s17 = smov 0  }
   0x5 LB: > { %s522_s18 = sadd.s32 4294967295, %s755_s17   ;;  %p51_p0 = scmp.ne.s32.totalorder %s739_s13, %s735_s12  ;;  %s755_s17 = sphi %s804_s17, %s17_s17   ;;  %s751_s16 = sphi %s802_s16, %s982_s16   ;;  %s747_s15 = sphi %s800_s15, %s981_s15   ;;  %s743_s14 = sphi %s798_s14, %s980_s14   ;;  %s739_s13 = sphi %s796_s13, %s979_s13   ;;  %s735_s12 = sphi %s794_s12, %s978_s12  }
   0x6   : > { %p824_p1 = scmp.eq.s32.totalorder %s522_s18, 0  ;;  %p828_p2 = scmp.eq.s32.totalorder %s522_s18, 1 }
   0x7   : > { %p524_p3 = scmp.ge.s32.totalorder %s755_s17, 1  ;;  %p132_p4 = scmp.lt.s32.totalorder %s755_s17, 3 }
   0x8   : > { %p836_p5 = por %p824_p1, %p51_p0  ;;  %s757_s23 = smov [#allocation4]  }
   0x9   : > { %p840_p6 = pnand %p524_p3, %p132_p4  ;;  %s144_s24 = sshll.u32 %s757_s23, 4  ;;  %s145_s24 = int_to_ptr.vmem [resolvable:$true] %s144_s24 }
   0xa   : > { %s973_s21 = scalar_select %p836_p5, 1, 0 }
   0xb   : > { %p570_p7 = pneg %p840_p6  ;;  %s658_s25 = scalar_lea.vmem %s145_s24, 256 }
   0xc   : > { %p659_p10 = scmp.ne.s32.totalorder %s145_s24, %s658_s25  ;;  %p666_p13 = scmp.lt.s32.totalorder %s145_s24, %s145_s24 }
   0xd   : > { %p571_p8 = pnand %p570_p7, %p824_p1  ;;  %p667_p0 = scmp.lt.s32.totalorder %s658_s25, %s658_s25 }
   0xf   : > { %p649_p9 = pneg %p571_p8  ;;  %p668_p5 = por %p667_p0, %p666_p13 }
  0x11   : > { %p661_p11 = pnand %p659_p10, %p649_p9 }
  0x13   : > { %p662_p12 = pneg %p661_p11 }
  0x15   : > { %p669_p3 = pnand %p668_p5, %p662_p12 }
  0x17   : > { %672 = shalt.err (!%p669_p3)
}
  0x18   : > { %s758_s26 = smov 64   ;;  %s759_s27 = smov 4  }
  0x19   : > { %573 = dma.hbm_to_vmem [thread:$0]  (!%p571_p8), %s967_s1, 256, %s145_s24, [#allocation5], %s758_s26, %s758_s26, %s759_s27  }
  0x1a   : > { %s29_s30 = sadd.s32 1, %s751_s16  ;;  %s38_s4 = sadd.s32 1, %s743_s14 }
  0x1b   : > { %p31_p4 = scmp.ge.s32.totalorder %s29_s30, 2  ;;  %p45_p5 = scmp.ne.s32.totalorder %s743_s14, %s739_s13 }
  0x1c   : > { %p46_p7 = scmp.eq.s32.totalorder %s755_s17, 0  ;;  %p579_p9 = scmp.lt.s32.totalorder %s755_s17, 2 }
  0x1d   : > { %s984_s30 = smov (%p31_p4, %s29_s30), 0  ;;  %p861_p11 = por %p828_p2, %p45_p5 }
  0x1e   : > { %p47_p10 = por %p46_p7, %p45_p5  ;;  %s33_s6 = ssub.s32 %s751_s16, %s984_s30 }
  0x1f   : > { %s161_s7 = sand.u32 1, %s743_s14   ;;  %p36_p12 = scmp.eq.s32.totalorder %s33_s6, 0 }
  0x20   : > { %s527_s8 = sshll.u32 %s161_s7, 3  ;;  %s528_s9 = sshll.u32 %s751_s16, 7 }
  0x21   : > { %s870_s10 = scalar_select %p36_p12, %s743_s14, %s38_s4  }
  0x22   : > { %s171_s18 = scalar_lea.hbm %s966_s0, %s528_s9  ;;  %s165_s23 = scalar_lea.vmem [#allocation2], %s527_s8 }
  0x23   : > { %s173_s24 = sshll.u32 %s165_s23, 4  ;;  %p877_p8 = pnand %p579_p9, %p47_p10  ;;  %s174_s24 = int_to_ptr.vmem [resolvable:$true] %s173_s24 }
  0x24   : > { %s162_s25 = scalar_lea.sflag [#allocation3], %s161_s7  ;;  %s686_s26 = scalar_lea.vmem %s174_s24, 128 }
  0x25   : > { %p675_p2 = pneg %p877_p8  ;;  %p687_p13 = scmp.ne.s32.totalorder %s174_s24, %s686_s26 }
  0x26   : > { %s760_s27 = smov [#allocation2]  }
  0x27   : > { %p689_p0 = pnand %p687_p13, %p675_p2  ;;  %s691_s28 = sshll.u32 %s760_s27, 4  ;;  %s692_s28 = int_to_ptr.vmem [resolvable:$false] %s691_s28 }
  0x28   : > { %s693_s29 = scalar_lea.vmem %s692_s28, 256  ;;  %p694_p4 = scmp.lt.s32.totalorder %s174_s24, %s692_s28 }
  0x29   : > { %p690_p3 = pneg %p689_p0  ;;  %p695_p5 = scmp.lt.s32.totalorder %s693_s29, %s686_s26 }
  0x2b   : > { %p696_p7 = por %p695_p5, %p694_p4 }
  0x2d   : > { %p697_p9 = pnand %p696_p7, %p690_p3 }
  0x2f   : > { %700 = shalt.err (!%p697_p9)
}
  0x30   : > { %577 = dma.hbm_to_vmem [thread:$0]  (!%p877_p8), %s171_s18, 128, %s174_s24, %s162_s25  }
  0x31   : > { %182 = sbr.rel (%p840_p6) target bundleno = 407 (0x197), region = 32  ;;  %s888_s4 = sand.u32 (!%p840_p6), 1, %s739_s13  }
  0x32   : > { %s530_s6 = sshll.u32 (!%p840_p6), %s888_s4, 3  ;;  %s185_s7 = scalar_lea.sflag (!%p840_p6), [#allocation3], %s888_s4 }
  0x33   : > { %s188_s8 = scalar_lea.vmem (!%p840_p6), [#allocation2], %s530_s6  ;;  %p977_p10 = scmp.ne.s32.totalorder (!%p840_p6), %s973_s21, 0 }
  0x36   : > { %726 = dma.done.wait (%p977_p10), %s185_s7, 128  }
  0x37   : > { %728 = vsyncadd (%p977_p10), %s185_s7, 4294967168 }
  0x38   : > { %730 = dma.done.wait (%p824_p1), [#allocation5], 256  }
  0x39   : > { %732 = vsyncadd (%p824_p1), [#allocation5], 4294967040  ;;  %v761_v0 = vmov 0.0   ;;  %vm762_vm0 = vmmov 0   ;;  %v645_v1 = vld [vmem:[#allocation4 + $0x8] sm:$0xff]   ;;  %v646_v2 = vld [vmem:[#allocation4] sm:$0xff]  }
  0x3a   : > { %555 = vmatprep.subr.bf16.mxu0 %v761_v0  ;;  %559 = vmatprep.mubr.msk.bf16.mxu0 %vm762_vm0, %v761_v0  ;;  %v215_v3 = vld [vmem:[%s188_s8] sm:$0xff]  ;;  %vm240_vm1 = vcmask 261120   ;;  %s563_s19 = smul.u32 48, %s888_s4  ;;  %vm285_vm2 = vcmask 60416   ;;  %s763_s9 = smov 104  }
  0x3b   : > { %556 = vmatpush3.bf16.msra.mxu0 %v645_v1  ;;  %v216_v4 = vpack.c.bf16 %v215_v3, %v215_v3  ;;  %v532_v5 = vld [vmem:[%s968_s2] ss:$0 sm:$0xff]  ;;  %s764_s11 = smov 120   ;;  %s765_s18 = smov 96  }
  0x3c   : > { %557 = vmatprep.subr.bf16.mxu0 %v761_v0  ;;  %s904_s12 = scalar_lea.vmem [#allocation6], %s563_s19  ;;  %s766_s23 = smov 112  }
  0x3d   : > { %s767_s24 = smov 80   ;;  %s768_s20 = smov 88  }
  0x3e   : > { %s769_s25 = smov 64   ;;  %s770_s26 = smov 72  }
  0x3f   : > { %558 = vmatpush3.bf16.msra.mxu0 %v646_v2  ;;  %s771_s27 = smov 48   ;;  %s772_s28 = smov 56  }
  0x40   : > { %s773_s29 = smov 40   ;;  %s548_s4 = sshll.u32 (%p861_p11), %s747_s15, 2 }
  0x41   : > { %s354_s8 = scalar_lea.vmem (%p861_p11), %s969_s3, %s548_s4 }
  0x42   : > { %560 = vmatmul.mubr.msk.bf16.vlgmr.msra.gmra.mxu0 %vm240_vm1, %v216_v4 }
 0x102   : > { %v278_v6 = vpop.f32.mrf.mxu0 }
 0x103   : > { %v279_v7 = vadd.f32 %v532_v5, %v278_v6 }
 0x104   : > { %v561_v8 = vpop.f32.mrf.mxu0 }
 0x105   : > { %v284_v9 = vpack.c.bf16 %v279_v7, %v279_v7 }
 0x106   : > { %v281_v10 = vpop.f32.mrf.mxu0 }
 0x107   : > { %300 = vrot.lane.b32.xlu1 %v284_v9, %s763_s9  ;;  %290 = vrot.lane.b32.xlu0 %v284_v9, %s764_s11  ;;  %286 = vst.msk [vmem:[%s904_s12] sm:$0xf] %vm285_vm2, %v284_v9 }
 0x108   : > { %v562_v11 = vpop.f32.mrf.mxu0 }
 0x10b   : > { %305 = vrot.lane.b32.xlu1 %v284_v9, %s765_s18  ;;  %295 = vrot.lane.b32.xlu0 %v284_v9, %s766_s23 }
 0x10e   : > { %v371_v23 = vld [vmem:[%s904_s12] sm:$0xf] (%p861_p11) }
 0x10f   : > { %315 = vrot.lane.b32.xlu1 %v284_v9, %s767_s24  ;;  %310 = vrot.lane.b32.xlu0 %v284_v9, %s768_s20  ;;  %372 = vst [vmem:[%s354_s8] sm:$0xf] (%p861_p11), %v371_v23 }
 0x113   : > { %325 = vrot.lane.b32.xlu1 %v284_v9, %s769_s25  ;;  %320 = vrot.lane.b32.xlu0 %v284_v9, %s770_s26 }
 0x117   : > { %335 = vrot.lane.b32.xlu1 %v284_v9, %s771_s27  ;;  %330 = vrot.lane.b32.xlu0 %v284_v9, %s772_s28 }
 0x11b   : > { %340 = vrot.lane.b32.xlu0 %v284_v9, %s773_s29 }
 0x179   : > { %v301_v12 = vpop.permute.xlu1 %300  ;;  %v291_v13 = vpop.permute.xlu0 %290 }
 0x17a   : > { %539 = vst.msk [vmem:[%s904_s12 + $0xc] sm:$0xf] %vm285_vm2, %v301_v12  ;;  %537 = vst.msk [vmem:[%s904_s12 + $0x4] sm:$0xf] %vm285_vm2, %v291_v13 }
 0x17d   : > { %v306_v14 = vpop.permute.xlu1 %305  ;;  %v296_v15 = vpop.permute.xlu0 %295 }
 0x17e   : > { %540 = vst.msk [vmem:[%s904_s12 + $0x10] sm:$0xf] %vm285_vm2, %v306_v14  ;;  %538 = vst.msk [vmem:[%s904_s12 + $0x8] sm:$0xf] %vm285_vm2, %v296_v15 }
 0x181   : > { %v316_v16 = vpop.permute.xlu1 %315  ;;  %v311_v17 = vpop.permute.xlu0 %310  ;;  %v373_v24 = vld [vmem:[%s904_s12 + $0x4] sm:$0xf] (%p861_p11)  ;;  %v377_v26 = vld [vmem:[%s904_s12 + $0xc] sm:$0xf] (%p861_p11) }
 0x182   : > { %542 = vst.msk [vmem:[%s904_s12 + $0x18] sm:$0xf] %vm285_vm2, %v316_v16  ;;  %541 = vst.msk [vmem:[%s904_s12 + $0x14] sm:$0xf] %vm285_vm2, %v311_v17 }
 0x183   : > { %374 = vst [vmem:[%s354_s8 + $0x8] sm:$0xf] (%p861_p11), %v373_v24  ;;  %378 = vst [vmem:[%s354_s8 + $0x18] sm:$0xf] (%p861_p11), %v377_v26 }
 0x185   : > { %v326_v18 = vpop.permute.xlu1 %325  ;;  %v321_v19 = vpop.permute.xlu0 %320  ;;  %v375_v25 = vld [vmem:[%s904_s12 + $0x8] sm:$0xf] (%p861_p11)  ;;  %v379_v27 = vld [vmem:[%s904_s12 + $0x10] sm:$0xf] (%p861_p11) }
 0x186   : > { %544 = vst.msk [vmem:[%s904_s12 + $0x20] sm:$0xf] %vm285_vm2, %v326_v18  ;;  %543 = vst.msk [vmem:[%s904_s12 + $0x1c] sm:$0xf] %vm285_vm2, %v321_v19 }
 0x187   : > { %376 = vst [vmem:[%s354_s8 + $0x10] sm:$0xf] (%p861_p11), %v375_v25  ;;  %380 = vst [vmem:[%s354_s8 + $0x20] sm:$0xf] (%p861_p11), %v379_v27 }
 0x189   : > { %v336_v20 = vpop.permute.xlu1 %335  ;;  %v331_v21 = vpop.permute.xlu0 %330  ;;  %v381_v28 = vld [vmem:[%s904_s12 + $0x14] sm:$0xf] (%p861_p11)  ;;  %v383_v29 = vld [vmem:[%s904_s12 + $0x18] sm:$0xf] (%p861_p11) }
 0x18a   : > { %546 = vst.msk [vmem:[%s904_s12 + $0x28] sm:$0xf] %vm285_vm2, %v336_v20  ;;  %545 = vst.msk [vmem:[%s904_s12 + $0x24] sm:$0xf] %vm285_vm2, %v331_v21  ;;  %351 = sbr.rel (!%p861_p11) target bundleno = 407 (0x197), region = 44 }
 0x18b   : > { %382 = vst [vmem:[%s354_s8 + $0x28] sm:$0xf] (%p861_p11), %v381_v28  ;;  %384 = vst [vmem:[%s354_s8 + $0x30] sm:$0xf] (%p861_p11), %v383_v29 }
 0x18d   : > { %v341_v22 = vpop.permute.xlu0 %340  ;;  %v385_v30 = vld [vmem:[%s904_s12 + $0x1c] sm:$0xf] (%p861_p11)  ;;  %v387_v31 = vld [vmem:[%s904_s12 + $0x20] sm:$0xf] (%p861_p11) }
 0x18e   : > { %547 = vst.msk [vmem:[%s904_s12 + $0x2c] sm:$0xf] %vm285_vm2, %v341_v22  ;;  %386 = vst [vmem:[%s354_s8 + $0x38] sm:$0xf] (%p861_p11), %v385_v30 }
 0x18f   : > { %388 = vst [vmem:[%s354_s8 + $0x40] sm:$0xf] %v387_v31 }
 0x191   : > { %v389_v32 = vld [vmem:[%s904_s12 + $0x24] sm:$0xf]  ;;  %v391_v33 = vld [vmem:[%s904_s12 + $0x28] sm:$0xf] }
 0x192   : > { %390 = vst [vmem:[%s354_s8 + $0x48] sm:$0xf] %v389_v32  ;;  %392 = vst [vmem:[%s354_s8 + $0x50] sm:$0xf] %v391_v33 }
 0x195   : > { %v393_v34 = vld [vmem:[%s904_s12 + $0x2c] sm:$0xf] }
 0x196   : > { %394 = vst [vmem:[%s354_s8 + $0x58] sm:$0xf] %v393_v34 }
 0x197 PF: > { %s17_s17 = sadd.s32 1, %s755_s17   ;;  %s978_s12 = smov %s739_s13 }
 0x198   : > { %p14_p1 = scmp.ge.s32.totalorder %s17_s17, 4   ;;  %s979_s13 = smov %s743_s14 }
 0x199   : > { %s980_s14 = smov %s870_s10  ;;  %s981_s15 = smov %s751_s16 }
 0x19a   : > { %s982_s16 = smov %s984_s30  ;;  %16 = sbr.rel (!%p14_p1) target bundleno = 5 (0x5), region = 128 }
 0x19f   :  { %452 = vsyncpa [#allocation3], 1 }
 0x1a0   :  { %454 = vsyncpa [#allocation3 + $0x1], 1 }
 0x1a1   :  { %455 = vsyncpa [#allocation5], 1 }

</bundles_post_ra>
